<compile_context>
chip_gen: v7x
topology: tpu7x:2x2x1
jax: 0.10.0
libtpu: 0.0.40
codegen_flags: <defaults>
</compile_context>

<pallas_src>
import functools

import jax
import jax.numpy as jnp
from jax.experimental import pallas as pl
from jax.experimental.pallas import tpu as pltpu


def _round_up(x, m):
    return (x + m - 1) // m * m


def _fused_rgcn_kernel(a_ref, x_ref, w1_ref, b1_ref, w2_ref, b2_ref, o_ref,
                       *, num_rel, p):
    """Fused conv1 -> ReLU -> conv2 over all relations.

    a_ref : [N, R*N]     bf16  concatenated normalized adjacencies
    x_ref : [N, Pin]     bf16  input features (Fin zero-padded to Pin=128)
    w1_ref: [Pin, R*P]   bf16  [W1_1 | ... | W1_R], each padded to P columns
    b1_ref: [1, P]       f32   sum_r b1_r (zero-padded)
    w2_ref: [P, R*P]     bf16  [W2_1 | ... | W2_R]
    b2_ref: [1, P]       f32   sum_r b2_r (zero-padded)
    o_ref : [N, P]       f32
    """
    R, P = num_rel, p
    a = a_ref[...]                                   # [N, R*N] bf16
    x = x_ref[...]                                   # [N, Pin] bf16

    # ---------------- Layer 1 ----------------
    # One wide transform for all relations: [N, R*P] (f32 accumulation).
    xw = jnp.dot(x, w1_ref[...], preferred_element_type=jnp.float32)
    xw = xw.astype(jnp.bfloat16)
    # Restack 128-lane-aligned column blocks into [R*N, P] row blocks
    # (whole-vreg moves, stays in registers -- no VMEM scratch).
    xw_stacked = jnp.concatenate(
        [xw[:, r * P:(r + 1) * P] for r in range(R)], axis=0)
    # Relation-summed aggregation as a single MXU matmul with K = R*N.
    h = jnp.dot(a, xw_stacked, preferred_element_type=jnp.float32)
    h = jnp.maximum(h + b1_ref[...], 0.0).astype(jnp.bfloat16)   # ReLU, [N, P]

    # ---------------- Layer 2 ----------------
    hw = jnp.dot(h, w2_ref[...], preferred_element_type=jnp.float32)
    hw = hw.astype(jnp.bfloat16)
    hw_stacked = jnp.concatenate(
        [hw[:, r * P:(r + 1) * P] for r in range(R)], axis=0)
    out = jnp.dot(a, hw_stacked, preferred_element_type=jnp.float32)
    o_ref[...] = (out + b2_ref[...]).astype(o_ref.dtype)


def pack_graph(a_norm):
    """One-time relayout: [R, N, N] normalized adjacencies -> [N, R*N] bf16
    with A_flat[d, r*N + s] = A_r[d, s]. Do this once per graph, not per call."""
    R, N, _ = a_norm.shape
    return a_norm.transpose(1, 0, 2).reshape(N, R * N).astype(jnp.bfloat16)


def pack_params(params):
    """One-time parameter packing: pad to lane-dense widths, concat relations
    along the output axis, pre-sum biases, cast weights to bf16."""
    R, in_feats, hid_feats = params["w1"].shape
    out_feats = params["w2"].shape[2]
    pin = _round_up(max(in_feats, 1), 128)
    p = _round_up(max(hid_feats, out_feats, 1), 128)

    w1 = jnp.pad(params["w1"], ((0, 0), (0, pin - in_feats), (0, p - hid_feats)))
    w1 = w1.transpose(1, 0, 2).reshape(pin, R * p).astype(jnp.bfloat16)
    w2 = jnp.pad(params["w2"], ((0, 0), (0, p - hid_feats), (0, p - out_feats)))
    w2 = w2.transpose(1, 0, 2).reshape(p, R * p).astype(jnp.bfloat16)
    b1 = jnp.pad(params["b1"].sum(axis=0),
                 (0, p - hid_feats)).reshape(1, p).astype(jnp.float32)
    b2 = jnp.pad(params["b2"].sum(axis=0),
                 (0, p - out_feats)).reshape(1, p).astype(jnp.float32)
    return {"w1": w1, "b1": b1, "w2": w2, "b2": b2,
            "R": R, "in_feats": in_feats, "out_feats": out_feats,
            "pin": pin, "p": p}


def rgcn_forward(a_flat, x, packed):
    """Two-layer RGCN forward.  a_flat: [N, R*N] bf16 (from pack_graph),
    x: [N, Fin] f32, packed: output of pack_params."""
    N, fin = x.shape
    R, pin, p = packed["R"], packed["pin"], packed["p"]
    x_bf = jnp.pad(x, ((0, 0), (0, pin - fin))).astype(jnp.bfloat16)

    kernel = functools.partial(_fused_rgcn_kernel, num_rel=R, p=p)
    vmem_spec = pl.BlockSpec(memory_space=pltpu.MemorySpace.VMEM)
    out_padded = pl.pallas_call(
        kernel,
        out_shape=jax.ShapeDtypeStruct((N, p), jnp.float32),
        in_specs=[vmem_spec] * 6,
        out_specs=vmem_spec,
    )(a_flat, x_bf, packed["w1"], packed["b1"], packed["w2"], packed["b2"])
    return out_padded[:, :packed["out_feats"]]


def normalize_adjacency(adj):
    """DGL GraphConv norm='both': A_norm[i,j] = A[i,j] / sqrt(deg_in(i)*deg_out(j)),
    degrees clamped to a minimum of 1. adj is [N_dst, N_src]."""
    deg_in = jnp.maximum(adj.sum(axis=1), 1.0)    # per dst node
    deg_out = jnp.maximum(adj.sum(axis=0), 1.0)   # per src node
    return adj * (deg_in[:, None] ** -0.5) * (deg_out[None, :] ** -0.5)


def reference_forward(a_norm, x, params):
    """Plain-JAX fp32 reference of the same math."""
    h = jnp.zeros((x.shape[0], params["w1"].shape[2]), jnp.float32)
    for r in range(a_norm.shape[0]):
        h = h + a_norm[r] @ (x @ params["w1"][r]) + params["b1"][r]
    h = jnp.maximum(h, 0.0)
    out = jnp.zeros((x.shape[0], params["w2"].shape[2]), jnp.float32)
    for r in range(a_norm.shape[0]):
        out = out + a_norm[r] @ (h @ params["w2"][r]) + params["b2"][r]
    return out


if __name__ == "__main__":
    # Small synthetic heterograph: single node type, 3 relation types.
    N = 64          # number of nodes
    R = 3           # len(rel_names)
    in_feats = 32
    hid_feats = 32
    out_feats = 16

    key = jax.random.PRNGKey(0)
    k_adj, k_x, k_w1, k_b1, k_w2, k_b2 = jax.random.split(key, 6)

    # Random sparse-ish adjacency per relation, then GraphConv 'both' norm.
    adj = (jax.random.uniform(k_adj, (R, N, N)) < 0.15).astype(jnp.float32)
    a_norm = jax.vmap(normalize_adjacency)(adj)

    x = jax.random.normal(k_x, (N, in_feats), dtype=jnp.float32)

    # Deterministic per-relation GraphConv parameters (weight + bias each).
    params = {
        "w1": jax.random.normal(k_w1, (R, in_feats, hid_feats), jnp.float32)
        * (1.0 / jnp.sqrt(in_feats)),
        "b1": jax.random.normal(k_b1, (R, hid_feats), jnp.float32) * 0.1,
        "w2": jax.random.normal(k_w2, (R, hid_feats, out_feats), jnp.float32)
        * (1.0 / jnp.sqrt(hid_feats)),
        "b2": jax.random.normal(k_b2, (R, out_feats), jnp.float32) * 0.1,
    }

    # One-time packing (hoisted off the per-call critical path).
    a_flat = jax.block_until_ready(pack_graph(a_norm))
    packed = jax.block_until_ready(pack_params(params))

    out = rgcn_forward(a_flat, x, packed)
    out = jax.block_until_ready(out)

    ref = reference_forward(a_norm, x, params)
    assert out.shape == (N, out_feats)
    # bf16 inputs with f32 accumulation -> loosened tolerance vs fp32 reference.
    assert jnp.allclose(out, ref, atol=5e-2, rtol=5e-2), (
        float(jnp.max(jnp.abs(out - ref))))

    print("KERNEL_OK")
</pallas_src>

<mosaic_0001>
module attributes {stable_mosaic.version = 11 : i64} {
  func.func @_fused_rgcn_kernel(%arg0: memref<64x192xbf16, #tpu.memory_space<vmem>>, %arg1: memref<64x128xbf16, #tpu.memory_space<vmem>>, %arg2: memref<128x384xbf16, #tpu.memory_space<vmem>>, %arg3: memref<1x128xf32, #tpu.memory_space<vmem>>, %arg4: memref<128x384xbf16, #tpu.memory_space<vmem>>, %arg5: memref<1x128xf32, #tpu.memory_space<vmem>>, %arg6: memref<64x128xf32, #tpu.memory_space<vmem>>) attributes {dimension_semantics = [], scalar_prefetch = 0 : i64, scratch_operands = 0 : i64, tpu.core_type = #tpu.core_type<tc>} {
    %c0 = arith.constant 0 : index
    %c0_0 = arith.constant 0 : index
    %0 = vector.load %arg0[%c0, %c0_0] : memref<64x192xbf16, #tpu.memory_space<vmem>>, vector<64x192xbf16>
    %c0_1 = arith.constant 0 : index
    %c0_2 = arith.constant 0 : index
    %1 = vector.load %arg1[%c0_1, %c0_2] : memref<64x128xbf16, #tpu.memory_space<vmem>>, vector<64x128xbf16>
    %c0_3 = arith.constant 0 : index
    %c0_4 = arith.constant 0 : index
    %2 = vector.load %arg2[%c0_3, %c0_4] : memref<128x384xbf16, #tpu.memory_space<vmem>>, vector<128x384xbf16>
    %cst = arith.constant dense<0.000000e+00> : vector<64x384xf32>
    %3 = tpu.matmul %1, %2, %cst {dimension_numbers = #tpu.dot_dimension_numbers<[1], [0], [0], [1], [0, 0, 1, 1], [], []>} : vector<64x128xbf16>, vector<128x384xbf16>, vector<64x384xf32> -> vector<64x384xf32>
    %4 = arith.truncf %3 : vector<64x384xf32> to vector<64x384xbf16>
    %5 = vector.extract_strided_slice %4 {offsets = [0, 0], sizes = [64, 128], strides = [1, 1]} : vector<64x384xbf16> to vector<64x128xbf16>
    %6 = vector.extract_strided_slice %4 {offsets = [0, 128], sizes = [64, 128], strides = [1, 1]} : vector<64x384xbf16> to vector<64x128xbf16>
    %7 = vector.extract_strided_slice %4 {offsets = [0, 256], sizes = [64, 128], strides = [1, 1]} : vector<64x384xbf16> to vector<64x128xbf16>
    %8 = tpu.concatenate %5, %6, %7 in 0 : vector<64x128xbf16>, vector<64x128xbf16>, vector<64x128xbf16> -> vector<192x128xbf16>
    %cst_5 = arith.constant dense<0.000000e+00> : vector<64x128xf32>
    %9 = tpu.matmul %0, %8, %cst_5 {dimension_numbers = #tpu.dot_dimension_numbers<[1], [0], [0], [1], [0, 0, 1, 1], [], []>} : vector<64x192xbf16>, vector<192x128xbf16>, vector<64x128xf32> -> vector<64x128xf32>
    %c0_6 = arith.constant 0 : index
    %c0_7 = arith.constant 0 : index
    %10 = vector.load %arg3[%c0_6, %c0_7] : memref<1x128xf32, #tpu.memory_space<vmem>>, vector<1x128xf32>
    %11 = vector.broadcast %10 : vector<1x128xf32> to vector<64x128xf32>
    %12 = arith.addf %9, %11 : vector<64x128xf32>
    %cst_8 = arith.constant 0.000000e+00 : f32
    %13 = vector.broadcast %cst_8 : f32 to vector<64x128xf32>
    %14 = arith.maximumf %12, %13 : vector<64x128xf32>
    %15 = arith.truncf %14 : vector<64x128xf32> to vector<64x128xbf16>
    %c0_9 = arith.constant 0 : index
    %c0_10 = arith.constant 0 : index
    %16 = vector.load %arg4[%c0_9, %c0_10] : memref<128x384xbf16, #tpu.memory_space<vmem>>, vector<128x384xbf16>
    %cst_11 = arith.constant dense<0.000000e+00> : vector<64x384xf32>
    %17 = tpu.matmul %15, %16, %cst_11 {dimension_numbers = #tpu.dot_dimension_numbers<[1], [0], [0], [1], [0, 0, 1, 1], [], []>} : vector<64x128xbf16>, vector<128x384xbf16>, vector<64x384xf32> -> vector<64x384xf32>
    %18 = arith.truncf %17 : vector<64x384xf32> to vector<64x384xbf16>
    %19 = vector.extract_strided_slice %18 {offsets = [0, 0], sizes = [64, 128], strides = [1, 1]} : vector<64x384xbf16> to vector<64x128xbf16>
    %20 = vector.extract_strided_slice %18 {offsets = [0, 128], sizes = [64, 128], strides = [1, 1]} : vector<64x384xbf16> to vector<64x128xbf16>
    %21 = vector.extract_strided_slice %18 {offsets = [0, 256], sizes = [64, 128], strides = [1, 1]} : vector<64x384xbf16> to vector<64x128xbf16>
    %22 = tpu.concatenate %19, %20, %21 in 0 : vector<64x128xbf16>, vector<64x128xbf16>, vector<64x128xbf16> -> vector<192x128xbf16>
    %cst_12 = arith.constant dense<0.000000e+00> : vector<64x128xf32>
    %23 = tpu.matmul %0, %22, %cst_12 {dimension_numbers = #tpu.dot_dimension_numbers<[1], [0], [0], [1], [0, 0, 1, 1], [], []>} : vector<64x192xbf16>, vector<192x128xbf16>, vector<64x128xf32> -> vector<64x128xf32>
    %c0_13 = arith.constant 0 : index
    %c0_14 = arith.constant 0 : index
    %24 = vector.load %arg5[%c0_13, %c0_14] : memref<1x128xf32, #tpu.memory_space<vmem>>, vector<1x128xf32>
    %25 = vector.broadcast %24 : vector<1x128xf32> to vector<64x128xf32>
    %26 = arith.addf %23, %25 : vector<64x128xf32>
    %c0_15 = arith.constant 0 : index
    %c0_16 = arith.constant 0 : index
    %27 = vector.load %arg6[%c0_15, %c0_16] : memref<64x128xf32, #tpu.memory_space<vmem>>, vector<64x128xf32>
    tpu.vector_store %arg6[%c0_15, %c0_16], %26 {strides = array<i32>} : memref<64x128xf32, #tpu.memory_space<vmem>>, vector<64x128xf32>,
    return
  }
}

</mosaic_0001>

<bundles_post_ra>
// kernel: tpu_custom_call.1
= control target key start
LH: loop header
LB: loop body
LE: loop exit
PB: predicated region body
PF: predicated region fallthrough
CT: control target
= control target key end

     0   :  { %11 = vsyncpa [#allocation3], 0  ;;  %s1515_s0 = inlined_call_operand.hbm [shape: bf16[64,192], index: 0, kind: input, shape index: {}]   ;;  %s1516_s1 = inlined_call_operand.hbm [shape: bf16[64,128], index: 1, kind: input, shape index: {}]   ;;  %s1517_s2 = inlined_call_operand.hbm [shape: bf16[128,384], index: 2, kind: input, shape index: {}]   ;;  %s1518_s3 = inlined_call_operand.vmem [shape: f32[1,128], index: 3, kind: input, shape index: {}]   ;;  %s1519_s4 = inlined_call_operand.hbm [shape: bf16[128,384], index: 4, kind: input, shape index: {}]   ;;  %s1520_s5 = inlined_call_operand.vmem [shape: f32[1,128], index: 5, kind: input, shape index: {}]   ;;  %s1521_s6 = inlined_call_operand.hbm [shape: f32[64,128], index: 6, kind: output, shape index: {}]  }
   0x1   :  { %12 = vsyncpa [#allocation6], 0 }
   0x2   :  { %13 = vsyncpa [#allocation9], 0 }
   0x3   :  { %14 = vsyncpa [#allocation4], 0  ;;  %s1324_s21 = smov [#allocation5]   ;;  %s1206_s25 = scalar_lea.hbm %s1516_s1, 512 }
   0x4   :  { %s32_s22 = sshll.u32 %s1324_s21, 4  ;;  %p1207_p0 = scmp.ne.s32.totalorder %s1516_s1, %s1206_s25  ;;  %s33_s22 = int_to_ptr.vmem [resolvable:$true] %s32_s22 }
   0x5   :  { %p1210_p1 = scmp.lt.u32.totalorder %s1206_s25, %s1516_s1 }
   0x7   :  { %p1212_p2 = pnand %p1210_p1, %p1207_p0 }
   0x9   :  { %1215 = shalt.err (!%p1212_p2)
}
   0xa   :  { %s1216_s30 = scalar_lea.vmem %s33_s22, 512  ;;  %p1221_p4 = scmp.lt.s32.totalorder %s33_s22, %s33_s22 }
   0xb   :  { %p1217_p3 = scmp.ne.s32.totalorder %s33_s22, %s1216_s30  ;;  %p1222_p5 = scmp.lt.s32.totalorder %s1216_s30, %s1216_s30 }
   0xd   :  { %p1223_p6 = por %p1222_p5, %p1221_p4 }
   0xf   :  { %p1224_p7 = pnand %p1223_p6, %p1217_p3 }
  0x11   :  { %1227 = shalt.err (!%p1224_p7)
}
  0x12   :  { %s1325_s7 = smov 64   ;;  %s1326_s8 = smov 4  }
  0x13   :  { %38 = dma.hbm_to_vmem [thread:$0]  %s1516_s1, 512, %s33_s22, [#allocation6], %s1325_s7, %s1325_s7, %s1326_s8  }
  0x14   :  { %s1327_s11 = smov [#allocation2]   ;;  %s1228_s15 = scalar_lea.hbm %s1515_s0, 1024 }
  0x15   :  { %s20_s12 = sshll.u32 %s1327_s11, 4  ;;  %p1229_p8 = scmp.ne.s32.totalorder %s1515_s0, %s1228_s15  ;;  %s21_s12 = int_to_ptr.vmem [resolvable:$true] %s20_s12 }
  0x16   :  { %p1232_p9 = scmp.lt.u32.totalorder %s1228_s15, %s1515_s0 }
  0x18   :  { %p1234_p10 = pnand %p1232_p9, %p1229_p8 }
  0x1a   :  { %1237 = shalt.err (!%p1234_p10)
}
  0x1b   :  { %s1238_s20 = scalar_lea.vmem %s21_s12, 1024  ;;  %p1243_p12 = scmp.lt.s32.totalorder %s21_s12, %s21_s12 }
  0x1c   :  { %p1239_p11 = scmp.ne.s32.totalorder %s21_s12, %s1238_s20  ;;  %p1244_p13 = scmp.lt.s32.totalorder %s1238_s20, %s1238_s20 }
  0x1e   :  { %p1245_p0 = por %p1244_p13, %p1243_p12 }
  0x20   :  { %p1246_p1 = pnand %p1245_p0, %p1239_p11 }
  0x22   :  { %1249 = shalt.err (!%p1246_p1)
}
  0x23   :  { %s1328_s1 = smov 128   ;;  %s1329_s21 = smov 8  }
  0x24   :  { %26 = dma.hbm_to_vmem [thread:$0]  %s1515_s0, 1024, %s21_s12, [#allocation3], %s1328_s1, %s1328_s1, %s1329_s21  }
  0x25   :  { %s1330_s24 = smov [#allocation7]   ;;  %s1250_s28 = scalar_lea.hbm %s1517_s2, 3072 }
  0x26   :  { %s44_s25 = sshll.u32 %s1330_s24, 4  ;;  %p1251_p2 = scmp.ne.s32.totalorder %s1517_s2, %s1250_s28  ;;  %s45_s25 = int_to_ptr.vmem [resolvable:$true] %s44_s25 }
  0x27   :  { %p1254_p3 = scmp.lt.u32.totalorder %s1250_s28, %s1517_s2 }
  0x29   :  { %p1256_p4 = pnand %p1254_p3, %p1251_p2 }
  0x2b   :  { %1259 = shalt.err (!%p1256_p4)
}
  0x2c   :  { %s1260_s9 = scalar_lea.vmem %s45_s25, 3072  ;;  %p1265_p6 = scmp.lt.s32.totalorder %s45_s25, %s45_s25 }
  0x2d   :  { %p1261_p5 = scmp.ne.s32.totalorder %s45_s25, %s1260_s9  ;;  %p1266_p7 = scmp.lt.s32.totalorder %s1260_s9, %s1260_s9 }
  0x2f   :  { %p1267_p8 = por %p1266_p7, %p1265_p6 }
  0x31   :  { %p1268_p9 = pnand %p1267_p8, %p1261_p5 }
  0x33   :  { %1271 = shalt.err (!%p1268_p9)
}
  0x34   :  { %s1331_s0 = smov 192   ;;  %s1332_s10 = smov 12  }
  0x35   :  { %50 = dma.hbm_to_vmem [thread:$0]  %s1517_s2, 3072, %s45_s25, [#allocation6], %s1331_s0, %s1331_s0, %s1332_s10  }
  0x36   :  { %s1333_s13 = smov [#allocation8]   ;;  %s1272_s17 = scalar_lea.hbm %s1519_s4, 3072 }
  0x37   :  { %s58_s14 = sshll.u32 %s1333_s13, 4  ;;  %p1273_p10 = scmp.ne.s32.totalorder %s1519_s4, %s1272_s17  ;;  %s59_s14 = int_to_ptr.vmem [resolvable:$true] %s58_s14 }
  0x38   :  { %p1276_p11 = scmp.lt.u32.totalorder %s1272_s17, %s1519_s4 }
  0x3a   :  { %p1278_p12 = pnand %p1276_p11, %p1273_p10 }
  0x3c   :  { %1281 = shalt.err (!%p1278_p12)
}
  0x3d   :  { %s1282_s23 = scalar_lea.vmem %s59_s14, 3072  ;;  %p1287_p0 = scmp.lt.s32.totalorder %s59_s14, %s59_s14 }
  0x3e   :  { %p1283_p13 = scmp.ne.s32.totalorder %s59_s14, %s1282_s23  ;;  %p1288_p1 = scmp.lt.s32.totalorder %s1282_s23, %s1282_s23 }
  0x40   :  { %p1289_p2 = por %p1288_p1, %p1287_p0 }
  0x42   :  { %p1290_p3 = pnand %p1289_p2, %p1283_p13 }
  0x44   :  { %1293 = shalt.err (!%p1290_p3)
}
  0x45   :  { %64 = dma.hbm_to_vmem [thread:$0]  %s1519_s4, 3072, %s59_s14, [#allocation9], %s1331_s0, %s1331_s0, %s1332_s10  }
  0x46   :  { %1316 = dma.done.wait [#allocation3], 1024  }
  0x47   :  { %1317 = vsyncadd [#allocation3], 4294966272 }
  0x48   :  { %1318 = dma.done.wait [#allocation6], 3584  }
  0x49   :  { %1319 = vsyncadd [#allocation6], 4294963712 }
  0x4a   :  { %1320 = dma.done.wait [#allocation9], 3072  }
  0x4b   :  { %1321 = vsyncadd [#allocation9], 4294964224  ;;  %v1334_v0 = vmov 0   ;;  %v1126_v1 = vld [vmem:[#allocation7 + $0x4] ss:$12 sps:$4 sm:$0xff]   ;;  %v1151_v21 = vld [vmem:[#allocation5 + $0x8] sm:$0xff]  }
  0x4c   :  { %312 = vmatprep.mubr.bf16.mxu1 %v1334_v0  ;;  %486 = vmatprep.subr.bf16.mxu0 %v1334_v0  ;;  %v1128_v2 = vld [vmem:[#allocation7] ss:$12 sps:$4 sm:$0xff]   ;;  %v1129_v3 = vld [vmem:[#allocation7 + $0x1c] ss:$12 sps:$4 sm:$0xff]   ;;  %v1131_v4 = vld [vmem:[#allocation7 + $0x18] ss:$12 sps:$4 sm:$0xff]  }
  0x4d   :  { %280 = vmatprep.subr.bf16.mxu1 %v1126_v1  ;;  %v1132_v5 = vld [vmem:[#allocation7 + $0x34] ss:$12 sps:$4 sm:$0xff]   ;;  %v1134_v6 = vld [vmem:[#allocation7 + $0x30] ss:$12 sps:$4 sm:$0xff]   ;;  %v1135_v7 = vld [vmem:[#allocation7 + $0x4c] ss:$12 sps:$4 sm:$0xff]  }
  0x4e   :  { %281 = vmatpush1.bf16.msra.mxu1 %v1128_v2  ;;  %v1137_v8 = vld [vmem:[#allocation7 + $0x48] ss:$12 sps:$4 sm:$0xff]   ;;  %v1138_v9 = vld [vmem:[#allocation7 + $0x64] ss:$12 sps:$4 sm:$0xff]   ;;  %v1140_v10 = vld [vmem:[#allocation7 + $0x60] ss:$12 sps:$4 sm:$0xff]  }
  0x4f   :  { %282 = vmatprep.subr.bf16.mxu1 %v1129_v3  ;;  %v1141_v11 = vld [vmem:[#allocation7 + $0x7c] ss:$12 sps:$4 sm:$0xff]   ;;  %v1143_v12 = vld [vmem:[#allocation7 + $0x78] ss:$12 sps:$4 sm:$0xff]   ;;  %v1144_v13 = vld [vmem:[#allocation7 + $0x94] ss:$12 sps:$4 sm:$0xff]  }
  0x50   :  { %v1146_v14 = vld [vmem:[#allocation7 + $0x90] ss:$12 sps:$4 sm:$0xff]   ;;  %v1147_v15 = vld [vmem:[#allocation7 + $0xac] ss:$12 sps:$4 sm:$0xff]   ;;  %v1149_v16 = vld [vmem:[#allocation7 + $0xa8] ss:$12 sps:$4 sm:$0xff]  }
  0x51   :  { %v1152_v17 = vld [vmem:[#allocation7 + $0x8] ss:$12 sps:$4 sm:$0xff]   ;;  %v1150_v18 = vld [vmem:[#allocation5] sm:$0xff]   ;;  %v1156_v22 = vld [vmem:[#allocation7 + $0x50] ss:$12 sps:$4 sm:$0xff]   ;;  %vm473_vm0 = vcmask 523264  }
  0x52   :  { %283 = vmatpush1.bf16.msra.mxu1 %v1131_v4  ;;  %v1153_v19 = vld [vmem:[#allocation7 + $0x20] ss:$12 sps:$4 sm:$0xff]   ;;  %v1155_v20 = vld [vmem:[#allocation7 + $0x38] ss:$12 sps:$4 sm:$0xff]   ;;  %v1158_v23 = vld [vmem:[#allocation7 + $0x68] ss:$12 sps:$4 sm:$0xff]  }
  0x53   :  { %284 = vmatprep.subr.bf16.mxu1 %v1132_v5  ;;  %v1154_v24 = vld [vmem:[#allocation5 + $0x10] sm:$0xff]   ;;  %v1159_v25 = vld [vmem:[#allocation7 + $0x80] ss:$12 sps:$4 sm:$0xff]   ;;  %v1160_v26 = vld [vmem:[#allocation7 + $0x98] ss:$12 sps:$4 sm:$0xff]  }
  0x54   :  { %v1157_v27 = vld [vmem:[#allocation5 + $0x18] sm:$0xff]   ;;  %v1428_v29 = vld [vmem:[#allocation2 + $0x4] ss:$8 sps:$4 sm:$0xff]   ;;  %v1182_v34 = vld [vmem:[#allocation8 + $0x34] ss:$12 sps:$4 sm:$0xff]  }
  0x55   :  { %v1161_v28 = vld [vmem:[#allocation7 + $0xb0] ss:$12 sps:$4 sm:$0xff]   ;;  %1009 = vmatprep.mubr.msk.bf16.mxu0 %vm473_vm0, %v1428_v29  ;;  %v1174_v30 = vld [vmem:[#allocation8] ss:$12 sps:$4 sm:$0xff]   ;;  %v1177_v33 = vld [vmem:[#allocation8 + $0x18] ss:$12 sps:$4 sm:$0xff]  }
  0x56   :  { %285 = vmatpush1.bf16.msra.mxu1 %v1134_v6  ;;  %v1176_v31 = vld [vmem:[#allocation8 + $0x4] ss:$12 sps:$4 sm:$0xff]   ;;  %v1179_v32 = vld [vmem:[#allocation8 + $0x1c] ss:$12 sps:$4 sm:$0xff]   ;;  %v1185_v36 = vld [vmem:[#allocation8 + $0x4c] ss:$12 sps:$4 sm:$0xff]  }
  0x57   :  { %286 = vmatprep.subr.bf16.mxu1 %v1135_v7  ;;  %v1180_v35 = vld [vmem:[#allocation8 + $0x30] ss:$12 sps:$4 sm:$0xff]   ;;  %v1183_v37 = vld [vmem:[#allocation8 + $0x48] ss:$12 sps:$4 sm:$0xff]   ;;  %v1186_v39 = vld [vmem:[#allocation8 + $0x60] ss:$12 sps:$4 sm:$0xff]  }
  0x58   :  { %v1188_v38 = vld [vmem:[#allocation8 + $0x64] ss:$12 sps:$4 sm:$0xff]   ;;  %v1191_v40 = vld [vmem:[#allocation8 + $0x7c] ss:$12 sps:$4 sm:$0xff]  }
  0x59   :  { %v1189_v41 = vld [vmem:[#allocation8 + $0x78] ss:$12 sps:$4 sm:$0xff]  }
  0x5a   :  { %287 = vmatpush1.bf16.msra.mxu1 %v1137_v8 }
  0x5b   :  { %288 = vmatprep.subr.bf16.mxu1 %v1138_v9 }
  0x5e   :  { %289 = vmatpush1.bf16.msra.mxu1 %v1140_v10 }
  0x5f   :  { %290 = vmatprep.subr.bf16.mxu1 %v1141_v11 }
  0x62   :  { %291 = vmatpush1.bf16.msra.mxu1 %v1143_v12 }
  0x63   :  { %292 = vmatprep.subr.bf16.mxu1 %v1144_v13 }
  0x66   :  { %293 = vmatpush1.bf16.msra.mxu1 %v1146_v14 }
  0x67   :  { %294 = vmatprep.subr.bf16.mxu1 %v1147_v15  ;;  %v1443_v15 = vld [vmem:[#allocation2] ss:$8 sps:$4 sm:$0xff]  }
  0x6a   :  { %295 = vmatpush1.bf16.msra.mxu1 %v1149_v16  ;;  %v1445_v16 = vld [vmem:[#allocation2 + $0x14] ss:$8 sps:$4 sm:$0xff]  }
  0x6b   :  { %1066 = vmatprep.subr.bf16.mxu1 %v1152_v17 }
  0x6d   :  { %313 = vmatmul.mubr.bf16.vlgmr.msra.gmra.mrb[0].mxu1 %v1150_v18 }
  0x6e   :  { %322 = vmatprep.mubr.bf16.mxu1 %v1334_v0  ;;  %1067 = vmatpush3.bf16.msra.mxu1 %v1152_v17  ;;  %v1451_v17 = vld [vmem:[#allocation2 + $0x10] ss:$8 sps:$4 sm:$0xff]  }
  0x6f   :  { %1068 = vmatprep.subr.bf16.mxu1 %v1153_v19 }
  0x72   :  { %1069 = vmatpush3.bf16.msra.mxu1 %v1153_v19  ;;  %v1458_v19 = vld [vmem:[#allocation2 + $0x20] ss:$8 sps:$4 sm:$0xff]  }
  0x73   :  { %1070 = vmatprep.subr.bf16.mxu1 %v1155_v20 }
  0x75   :  { %323 = vmatmul.mubr.bf16.gmra.mrb[4].mxu1 %v1151_v21 }
  0x76   :  { %332 = vmatprep.mubr.bf16.mxu1 %v1334_v0  ;;  %1071 = vmatpush3.bf16.msra.mxu1 %v1155_v20  ;;  %v1460_v20 = vld [vmem:[#allocation2 + $0x34] ss:$8 sps:$4 sm:$0xff]  }
  0x77   :  { %1072 = vmatprep.subr.bf16.mxu1 %v1156_v22 }
  0x7a   :  { %1073 = vmatpush3.bf16.msra.mxu1 %v1156_v22  ;;  %v1194_v22 = vld [vmem:[#allocation8 + $0x94] ss:$12 sps:$4 sm:$0xff]  }
  0x7b   :  { %1074 = vmatprep.subr.bf16.mxu1 %v1158_v23 }
  0x7d   :  { %333 = vmatmul.mubr.bf16.gmra.mrb[8].mxu1 %v1154_v24 }
  0x7e   :  { %342 = vmatprep.mubr.bf16.mxu1 %v1334_v0  ;;  %1075 = vmatpush3.bf16.msra.mxu1 %v1158_v23  ;;  %v1192_v23 = vld [vmem:[#allocation8 + $0x90] ss:$12 sps:$4 sm:$0xff]  }
  0x7f   :  { %1076 = vmatprep.subr.bf16.mxu1 %v1159_v25 }
  0x82   :  { %1077 = vmatpush3.bf16.msra.mxu1 %v1159_v25  ;;  %v1195_v25 = vld [vmem:[#allocation8 + $0xa8] ss:$12 sps:$4 sm:$0xff]  }
  0x83   :  { %1078 = vmatprep.subr.bf16.mxu1 %v1160_v26 }
  0x85   :  { %343 = vmatmul.mubr.bf16.gmra.mrb[12].mxu1 %v1157_v27 }
  0x86   :  { %1079 = vmatpush3.bf16.msra.mxu1 %v1160_v26  ;;  %1082 = vmatprep.mubr.bf16.mxu1 %v1150_v18  ;;  %v1453_v18 = vld [vmem:[#allocation2 + $0x24] ss:$8 sps:$4 sm:$0xff]   ;;  %v1198_v26 = vld [vmem:[#allocation8 + $0x8] ss:$12 sps:$4 sm:$0xff]  }
  0x87   :  { %1080 = vmatprep.subr.bf16.mxu1 %v1161_v28 }
  0x8a   :  { %1081 = vmatpush3.bf16.msra.mxu1 %v1161_v28 }
  0x8b   :  { %723 = vmatprep.subr.bf16.mxu1 %v1176_v31 }
  0x8d   :  { %1083 = vmatmul.mubr.bf16.vlgmr.msra.gmra.mrb[16].mxu1 %v1151_v21  ;;  %v1465_v21 = vld [vmem:[#allocation2 + $0x30] ss:$8 sps:$4 sm:$0xff]  }
  0x8e   :  { %1086 = vmatprep.mubr.bf16.mxu1 %v1154_v24  ;;  %724 = vmatpush1.bf16.msra.mxu1 %v1174_v30  ;;  %v1197_v24 = vld [vmem:[#allocation8 + $0xac] ss:$12 sps:$4 sm:$0xff]  }
  0x8f   :  { %725 = vmatprep.subr.bf16.mxu1 %v1179_v32 }
  0x92   :  { %726 = vmatpush1.bf16.msra.mxu1 %v1177_v33 }
  0x93   :  { %727 = vmatprep.subr.bf16.mxu1 %v1182_v34 }
  0x95   :  { %1087 = vmatmul.mubr.bf16.gmra.mrb[20].mxu1 %v1157_v27  ;;  %v1000_v27 = vld [vmem:[%s1518_s3] ss:$0 sm:$0xff] }
  0x96   :  { %755 = vmatprep.mubr.bf16.mxu1 %v1334_v0  ;;  %728 = vmatpush1.bf16.msra.mxu1 %v1180_v35 }
  0x97   :  { %729 = vmatprep.subr.bf16.mxu1 %v1185_v36 }
  0x9a   :  { %730 = vmatpush1.bf16.msra.mxu1 %v1183_v37  ;;  %v1199_v37 = vld [vmem:[#allocation8 + $0x20] ss:$12 sps:$4 sm:$0xff]  }
  0x9b   :  { %731 = vmatprep.subr.bf16.mxu1 %v1188_v38 }
  0x9e   :  { %732 = vmatpush1.bf16.msra.mxu1 %v1186_v39 }
  0x9f   :  { %733 = vmatprep.subr.bf16.mxu1 %v1191_v40 }
  0xa2   :  { %734 = vmatpush1.bf16.msra.mxu1 %v1189_v41 }
  0xa3   :  { %735 = vmatprep.subr.bf16.mxu1 %v1194_v22 }
  0xa6   :  { %736 = vmatpush1.bf16.msra.mxu1 %v1192_v23 }
  0xa7   :  { %737 = vmatprep.subr.bf16.mxu1 %v1197_v24 }
  0xaa   :  { %738 = vmatpush1.bf16.msra.mxu1 %v1195_v25 }
  0xab   :  { %1090 = vmatprep.subr.bf16.mxu1 %v1198_v26 }
 0x140   :  { %v314_v42 = vpop.f32.mrb[0].mxu1 }
 0x141   :  { %v316_v43 = vpop.f32.mrb[1].mxu1 }
 0x142   :  { %v318_v44 = vpop.f32.mrb[2].mxu1 }
 0x143   :  { %v418_v45 = vpack.c.bf16 %v318_v44, %v314_v42  ;;  %v320_v46 = vpop.f32.mrb[3].mxu1  ;;  %v1200_v44 = vld [vmem:[#allocation8 + $0x38] ss:$12 sps:$4 sm:$0xff]  }
 0x144   :  { %v419_v47 = vpack.c.bf16 %v320_v46, %v316_v43 }
 0x145   :  { %487 = vmatpush1.bf16.msra.mxu0 %v418_v45 }
 0x146   :  { %488 = vmatprep.subr.bf16.mxu0 %v1334_v0 }
 0x148   :  { %v324_v48 = vpop.f32.mrb[4].mxu1 }
 0x149   :  { %v326_v49 = vpop.f32.mrb[5].mxu1 }
 0x14a   :  { %v328_v50 = vpop.f32.mrb[6].mxu1 }
 0x14b   :  { %v421_v51 = vpack.c.bf16 %v328_v50, %v324_v48  ;;  %v330_v52 = vpop.f32.mrb[7].mxu1  ;;  %v1201_v48 = vld [vmem:[#allocation8 + $0x50] ss:$12 sps:$4 sm:$0xff]  }
 0x14c   :  { %v422_v53 = vpack.c.bf16 %v330_v52, %v326_v49 }
 0x14d   :  { %489 = vmatpush1.bf16.msra.mxu0 %v421_v51 }
 0x14e   :  { %490 = vmatprep.subr.bf16.mxu0 %v1334_v0 }
 0x150   :  { %v334_v54 = vpop.f32.mrb[8].mxu1 }
 0x151   :  { %v336_v55 = vpop.f32.mrb[9].mxu1 }
 0x152   :  { %v338_v56 = vpop.f32.mrb[10].mxu1 }
 0x153   :  { %v424_v57 = vpack.c.bf16 %v338_v56, %v334_v54  ;;  %v340_v58 = vpop.f32.mrb[11].mxu1 }
 0x154   :  { %v425_v59 = vpack.c.bf16 %v340_v58, %v336_v55  ;;  %v1202_v55 = vld [vmem:[#allocation8 + $0x68] ss:$12 sps:$4 sm:$0xff]  }
 0x155   :  { %491 = vmatpush1.bf16.msra.mxu0 %v424_v57 }
 0x156   :  { %492 = vmatprep.subr.bf16.mxu0 %v1334_v0 }
 0x158   :  { %v344_v60 = vpop.f32.mrb[12].mxu1 }
 0x159   :  { %v346_v61 = vpop.f32.mrb[13].mxu1 }
 0x15a   :  { %v348_v62 = vpop.f32.mrb[14].mxu1 }
 0x15b   :  { %v427_v63 = vpack.c.bf16 %v348_v62, %v344_v60  ;;  %v350_v1 = vpop.f32.mrb[15].mxu1 }
 0x15c   :  { %v428_v2 = vpack.c.bf16 %v350_v1, %v346_v61 }
 0x15d   :  { %493 = vmatpush1.bf16.msra.mxu0 %v427_v63 }
 0x15e   :  { %494 = vmatprep.subr.bf16.mxu0 %v1334_v0 }
 0x160   :  { %v1084_v3 = vpop.f32.mrb[16].mxu1 }
 0x161   :  { %495 = vmatpush1.bf16.msra.mxu0 %v419_v47  ;;  %v387_v4 = vpop.f32.mrb[17].mxu1 }
 0x162   :  { %496 = vmatprep.subr.bf16.mxu0 %v1334_v0  ;;  %v1085_v5 = vpop.f32.mrb[18].mxu1 }
 0x163   :  { %v423_v6 = vpack.c.bf16 %v1085_v5, %v1084_v3  ;;  %v390_v7 = vpop.f32.mrb[19].mxu1  ;;  %v1204_v3 = vld [vmem:[#allocation8 + $0x98] ss:$12 sps:$4 sm:$0xff]  }
 0x164   :  { %v420_v8 = vpack.c.bf16 %v390_v7, %v387_v4  ;;  %v1205_v7 = vld [vmem:[#allocation8 + $0xb0] ss:$12 sps:$4 sm:$0xff]  }
 0x165   :  { %497 = vmatpush1.bf16.msra.mxu0 %v422_v53 }
 0x166   :  { %498 = vmatprep.subr.bf16.mxu0 %v1334_v0 }
 0x168   :  { %v1088_v9 = vpop.f32.mrb[20].mxu1 }
 0x169   :  { %499 = vmatpush1.bf16.msra.mxu0 %v425_v59  ;;  %v403_v10 = vpop.f32.mrb[21].mxu1  ;;  %v1203_v59 = vld [vmem:[#allocation8 + $0x80] ss:$12 sps:$4 sm:$0xff]  }
 0x16a   :  { %500 = vmatprep.subr.bf16.mxu0 %v1334_v0  ;;  %v1089_v11 = vpop.f32.mrb[22].mxu1 }
 0x16b   :  { %v429_v12 = vpack.c.bf16 %v1089_v11, %v1088_v9  ;;  %v406_v13 = vpop.f32.mrb[23].mxu1 }
 0x16c   :  { %v426_v14 = vpack.c.bf16 %v406_v13, %v403_v10 }
 0x16d   :  { %501 = vmatpush1.bf16.msra.mxu0 %v428_v2 }
 0x16e   :  { %502 = vmatprep.subr.bf16.mxu0 %v1334_v0 }
 0x171   :  { %503 = vmatpush1.bf16.msra.mxu0 %v420_v8 }
 0x172   :  { %504 = vmatprep.subr.bf16.mxu0 %v1334_v0 }
 0x175   :  { %505 = vmatpush1.bf16.msra.mxu0 %v423_v6 }
 0x176   :  { %506 = vmatprep.subr.bf16.mxu0 %v1334_v0 }
 0x179   :  { %507 = vmatpush1.bf16.msra.mxu0 %v426_v14 }
 0x17a   :  { %508 = vmatprep.subr.bf16.mxu0 %v1334_v0 }
 0x17d   :  { %509 = vmatpush1.bf16.msra.mxu0 %v429_v12 }
 0x17e   :  { %880 = vmatprep.subr.bf16.mxu0 %v1334_v0 }
 0x180   :  { %519 = vmatmul.mubr.bf16.vlgmr.msra.gmra.mrb[0].mxu0 %v1443_v15 }
 0x181   :  { %1010 = vmatprep.mubr.msk.bf16.mxu0 %vm473_vm0, %v1445_v16 }
 0x188   :  { %527 = vmatmul.mubr.bf16.gmra.mrb[4].mxu0 %v1451_v17 }
 0x189   :  { %1011 = vmatprep.mubr.msk.bf16.mxu0 %vm473_vm0, %v1453_v18 }
 0x190   :  { %535 = vmatmul.mubr.bf16.gmra.mrb[8].mxu0 %v1458_v19 }
 0x191   :  { %1012 = vmatprep.mubr.msk.bf16.mxu0 %vm473_vm0, %v1460_v20 }
 0x198   :  { %543 = vmatmul.mubr.bf16.gmra.mrb[12].mxu0 %v1465_v21 }
 0x199   :  { %1038 = vmatprep.mubr.msk.bf16.mxu0 %vm473_vm0, %v1428_v29 }
 0x253   :  { %v520_v28 = vpop.f32.mrb[0].mxu0 }
 0x254   :  { %v521_v30 = vadd.f32 %v1000_v27, %v520_v28  ;;  %v522_v31 = vpop.f32.mrb[1].mxu0 }
 0x255   :  { %v523_v32 = vpop.f32.mrb[2].mxu0 }
 0x256   :  { %v524_v33 = vadd.f32 %v1000_v27, %v523_v32  ;;  %v525_v29 = vpop.f32.mrb[3].mxu0  ;;  %v551_v34 = vmax.f32 %v521_v30, 0.0 }
 0x258   :  { %v552_v35 = vmax.f32 %v524_v33, 0.0 }
 0x25a   :  { %v559_v36 = vpack.c.bf16 %v552_v35, %v551_v34 }
 0x25b   :  { %v528_v38 = vpop.f32.mrb[4].mxu0 }
 0x25c   :  { %v529_v39 = vadd.f32 %v1000_v27, %v528_v38  ;;  %v530_v40 = vpop.f32.mrb[5].mxu0  ;;  %756 = vmatmul.mubr.bf16.vlgmr.msra.gmra.mrb[24].mxu1 %v559_v36 }
 0x25d   :  { %v531_v41 = vpop.f32.mrb[6].mxu0  ;;  %1091 = vmatpush3.bf16.msra.mxu1 %v1198_v26  ;;  %765 = vmatprep.mubr.bf16.mxu1 %v1334_v0 }
 0x25e   :  { %v532_v42 = vadd.f32 %v1000_v27, %v531_v41  ;;  %v533_v43 = vpop.f32.mrb[7].mxu0  ;;  %1092 = vmatprep.subr.bf16.mxu1 %v1199_v37  ;;  %v553_v45 = vmax.f32 %v529_v39, 0.0 }
 0x260   :  { %v554_v46 = vmax.f32 %v532_v42, 0.0 }
 0x261   :  { %1093 = vmatpush3.bf16.msra.mxu1 %v1199_v37 }
 0x262   :  { %v560_v47 = vpack.c.bf16 %v554_v46, %v553_v45  ;;  %1094 = vmatprep.subr.bf16.mxu1 %v1200_v44 }
 0x263   :  { %v536_v49 = vpop.f32.mrb[8].mxu0 }
 0x264   :  { %v537_v50 = vadd.f32 %v1000_v27, %v536_v49  ;;  %v538_v51 = vpop.f32.mrb[9].mxu0  ;;  %766 = vmatmul.mubr.bf16.gmra.mrb[28].mxu1 %v560_v47 }
 0x265   :  { %v539_v52 = vpop.f32.mrb[10].mxu0  ;;  %1095 = vmatpush3.bf16.msra.mxu1 %v1200_v44  ;;  %775 = vmatprep.mubr.bf16.mxu1 %v1334_v0 }
 0x266   :  { %v540_v53 = vadd.f32 %v1000_v27, %v539_v52  ;;  %v541_v54 = vpop.f32.mrb[11].mxu0  ;;  %1096 = vmatprep.subr.bf16.mxu1 %v1201_v48  ;;  %v555_v56 = vmax.f32 %v537_v50, 0.0 }
 0x268   :  { %v556_v57 = vmax.f32 %v540_v53, 0.0 }
 0x269   :  { %1097 = vmatpush3.bf16.msra.mxu1 %v1201_v48 }
 0x26a   :  { %v561_v58 = vpack.c.bf16 %v556_v57, %v555_v56  ;;  %1098 = vmatprep.subr.bf16.mxu1 %v1202_v55 }
 0x26b   :  { %v544_v60 = vpop.f32.mrb[12].mxu0 }
 0x26c   :  { %v545_v61 = vadd.f32 %v1000_v27, %v544_v60  ;;  %v546_v62 = vpop.f32.mrb[13].mxu0  ;;  %776 = vmatmul.mubr.bf16.gmra.mrb[32].mxu1 %v561_v58 }
 0x26d   :  { %v547_v63 = vpop.f32.mrb[14].mxu0  ;;  %1099 = vmatpush3.bf16.msra.mxu1 %v1202_v55  ;;  %785 = vmatprep.mubr.bf16.mxu1 %v1334_v0 }
 0x26e   :  { %v548_v1 = vadd.f32 %v1000_v27, %v547_v63  ;;  %v549_v2 = vpop.f32.mrb[15].mxu0  ;;  %1100 = vmatprep.subr.bf16.mxu1 %v1203_v59  ;;  %v557_v4 = vmax.f32 %v545_v61, 0.0 }
 0x270   :  { %v558_v5 = vmax.f32 %v548_v1, 0.0 }
 0x271   :  { %1101 = vmatpush3.bf16.msra.mxu1 %v1203_v59 }
 0x272   :  { %v562_v6 = vpack.c.bf16 %v558_v5, %v557_v4  ;;  %1102 = vmatprep.subr.bf16.mxu1 %v1204_v3 }
 0x274   :  { %786 = vmatmul.mubr.bf16.gmra.mrb[36].mxu1 %v562_v6 }
 0x275   :  { %1103 = vmatpush3.bf16.msra.mxu1 %v1204_v3  ;;  %1106 = vmatprep.mubr.bf16.mxu1 %v559_v36 }
 0x276   :  { %1104 = vmatprep.subr.bf16.mxu1 %v1205_v7 }
 0x279   :  { %1105 = vmatpush3.bf16.msra.mxu1 %v1205_v7 }
 0x27c   :  { %1107 = vmatmul.mubr.bf16.vlgmr.msra.gmra.mrb[40].mxu1 %v560_v47 }
 0x27d   :  { %1110 = vmatprep.mubr.bf16.mxu1 %v561_v58 }
 0x284   :  { %1111 = vmatmul.mubr.bf16.gmra.mrb[44].mxu1 %v562_v6 }
 0x32f   :  { %v757_v8 = vpop.f32.mrb[24].mxu1 }
 0x330   :  { %v759_v9 = vpop.f32.mrb[25].mxu1 }
 0x331   :  { %v761_v10 = vpop.f32.mrb[26].mxu1 }
 0x332   :  { %v861_v11 = vpack.c.bf16 %v761_v10, %v757_v8  ;;  %v763_v12 = vpop.f32.mrb[27].mxu1 }
 0x333   :  { %v862_v13 = vpack.c.bf16 %v763_v12, %v759_v9 }
 0x334   :  { %881 = vmatpush1.bf16.msra.mxu0 %v861_v11 }
 0x335   :  { %882 = vmatprep.subr.bf16.mxu0 %v1334_v0 }
 0x337   :  { %v767_v14 = vpop.f32.mrb[28].mxu1 }
 0x338   :  { %v769_v22 = vpop.f32.mrb[29].mxu1 }
 0x339   :  { %v771_v23 = vpop.f32.mrb[30].mxu1 }
 0x33a   :  { %v864_v24 = vpack.c.bf16 %v771_v23, %v767_v14  ;;  %v773_v25 = vpop.f32.mrb[31].mxu1 }
 0x33b   :  { %v865_v26 = vpack.c.bf16 %v773_v25, %v769_v22 }
 0x33c   :  { %883 = vmatpush1.bf16.msra.mxu0 %v864_v24 }
 0x33d   :  { %884 = vmatprep.subr.bf16.mxu0 %v1334_v0 }
 0x33f   :  { %v777_v27 = vpop.f32.mrb[32].mxu1 }
 0x340   :  { %v779_v28 = vpop.f32.mrb[33].mxu1 }
 0x341   :  { %v781_v30 = vpop.f32.mrb[34].mxu1 }
 0x342   :  { %v867_v31 = vpack.c.bf16 %v781_v30, %v777_v27  ;;  %v783_v32 = vpop.f32.mrb[35].mxu1 }
 0x343   :  { %v868_v33 = vpack.c.bf16 %v783_v32, %v779_v28 }
 0x344   :  { %885 = vmatpush1.bf16.msra.mxu0 %v867_v31 }
 0x345   :  { %886 = vmatprep.subr.bf16.mxu0 %v1334_v0 }
 0x347   :  { %v787_v29 = vpop.f32.mrb[36].mxu1 }
 0x348   :  { %v789_v34 = vpop.f32.mrb[37].mxu1 }
 0x349   :  { %v791_v35 = vpop.f32.mrb[38].mxu1 }
 0x34a   :  { %v870_v36 = vpack.c.bf16 %v791_v35, %v787_v29  ;;  %v793_v37 = vpop.f32.mrb[39].mxu1 }
 0x34b   :  { %v871_v38 = vpack.c.bf16 %v793_v37, %v789_v34 }
 0x34c   :  { %887 = vmatpush1.bf16.msra.mxu0 %v870_v36 }
 0x34d   :  { %888 = vmatprep.subr.bf16.mxu0 %v1334_v0 }
 0x34f   :  { %v1108_v39 = vpop.f32.mrb[40].mxu1 }
 0x350   :  { %v830_v40 = vpop.f32.mrb[41].mxu1  ;;  %889 = vmatpush1.bf16.msra.mxu0 %v862_v13 }
 0x351   :  { %v1109_v41 = vpop.f32.mrb[42].mxu1  ;;  %890 = vmatprep.subr.bf16.mxu0 %v1334_v0 }
 0x352   :  { %v866_v42 = vpack.c.bf16 %v1109_v41, %v1108_v39  ;;  %v833_v43 = vpop.f32.mrb[43].mxu1 }
 0x353   :  { %v863_v44 = vpack.c.bf16 %v833_v43, %v830_v40 }
 0x354   :  { %891 = vmatpush1.bf16.msra.mxu0 %v865_v26 }
 0x355   :  { %892 = vmatprep.subr.bf16.mxu0 %v1334_v0 }
 0x357   :  { %v1112_v45 = vpop.f32.mrb[44].mxu1 }
 0x358   :  { %v846_v46 = vpop.f32.mrb[45].mxu1  ;;  %893 = vmatpush1.bf16.msra.mxu0 %v868_v33 }
 0x359   :  { %v1113_v47 = vpop.f32.mrb[46].mxu1  ;;  %894 = vmatprep.subr.bf16.mxu0 %v1334_v0 }
 0x35a   :  { %v872_v48 = vpack.c.bf16 %v1113_v47, %v1112_v45  ;;  %v849_v49 = vpop.f32.mrb[47].mxu1 }
 0x35b   :  { %v869_v50 = vpack.c.bf16 %v849_v49, %v846_v46 }
 0x35c   :  { %895 = vmatpush1.bf16.msra.mxu0 %v871_v38 }
 0x35d   :  { %896 = vmatprep.subr.bf16.mxu0 %v1334_v0 }
 0x360   :  { %897 = vmatpush1.bf16.msra.mxu0 %v863_v44 }
 0x361   :  { %898 = vmatprep.subr.bf16.mxu0 %v1334_v0 }
 0x364   :  { %899 = vmatpush1.bf16.msra.mxu0 %v866_v42 }
 0x365   :  { %900 = vmatprep.subr.bf16.mxu0 %v1334_v0 }
 0x368   :  { %901 = vmatpush1.bf16.msra.mxu0 %v869_v50 }
 0x369   :  { %902 = vmatprep.subr.bf16.mxu0 %v1334_v0  ;;  %v1037_v0 = vld [vmem:[%s1520_s5] ss:$0 sm:$0xff]  ;;  %s1335_s5 = smov [#allocation10]  }
 0x36a   :  { %s958_s27 = sshll.u32 %s1335_s5, 4  ;;  %s959_s27 = int_to_ptr.vmem [resolvable:$true] %s958_s27 }
 0x36b   :  { %s1294_s28 = scalar_lea.vmem %s959_s27, 1024  ;;  %p1299_p5 = scmp.lt.s32.totalorder %s959_s27, %s959_s27 }
 0x36c   :  { %903 = vmatpush1.bf16.msra.mxu0 %v872_v48  ;;  %p1295_p4 = scmp.ne.s32.totalorder %s959_s27, %s1294_s28  ;;  %p1300_p6 = scmp.lt.s32.totalorder %s1294_s28, %s1294_s28 }
 0x36e   :  { %p1301_p7 = por %p1300_p6, %p1299_p5 }
 0x36f   :  { %913 = vmatmul.mubr.bf16.vlgmr.msra.gmra.mrb[16].mxu0 %v1443_v15 }
 0x370   :  { %1039 = vmatprep.mubr.msk.bf16.mxu0 %vm473_vm0, %v1445_v16  ;;  %p1302_p8 = pnand %p1301_p7, %p1295_p4 }
 0x377   :  { %921 = vmatmul.mubr.bf16.gmra.mrb[20].mxu0 %v1451_v17 }
 0x378   :  { %1040 = vmatprep.mubr.msk.bf16.mxu0 %vm473_vm0, %v1453_v18 }
 0x37f   :  { %929 = vmatmul.mubr.bf16.gmra.mrb[24].mxu0 %v1458_v19 }
 0x380   :  { %1041 = vmatprep.mubr.msk.bf16.mxu0 %vm473_vm0, %v1460_v20 }
 0x387   :  { %937 = vmatmul.mubr.bf16.gmra.mrb[28].mxu0 %v1465_v21 }
 0x442   :  { %v914_v15 = vpop.f32.mrb[16].mxu0 }
 0x443   :  { %v915_v51 = vadd.f32 %v1037_v0, %v914_v15  ;;  %v916_v52 = vpop.f32.mrb[17].mxu0 }
 0x444   :  { %v917_v16 = vpop.f32.mrb[18].mxu0 }
 0x445   :  { %945 = vst [vmem:[#allocation10] sm:$0xff] %v915_v51  ;;  %v918_v17 = vadd.f32 %v1037_v0, %v917_v16  ;;  %v919_v53 = vpop.f32.mrb[19].mxu0 }
 0x447   :  { %946 = vst [vmem:[#allocation10 + $0x8] sm:$0xff] %v918_v17 }
 0x44a   :  { %v922_v18 = vpop.f32.mrb[20].mxu0 }
 0x44b   :  { %v923_v54 = vadd.f32 %v1037_v0, %v922_v18  ;;  %v924_v19 = vpop.f32.mrb[21].mxu0 }
 0x44c   :  { %v925_v55 = vpop.f32.mrb[22].mxu0 }
 0x44d   :  { %947 = vst [vmem:[#allocation10 + $0x10] sm:$0xff] %v923_v54  ;;  %v926_v20 = vadd.f32 %v1037_v0, %v925_v55  ;;  %v927_v56 = vpop.f32.mrb[23].mxu0 }
 0x44f   :  { %948 = vst [vmem:[#allocation10 + $0x18] sm:$0xff] %v926_v20 }
 0x452   :  { %v930_v21 = vpop.f32.mrb[24].mxu0 }
 0x453   :  { %v931_v57 = vadd.f32 %v1037_v0, %v930_v21  ;;  %v932_v58 = vpop.f32.mrb[25].mxu0 }
 0x454   :  { %v933_v59 = vpop.f32.mrb[26].mxu0 }
 0x455   :  { %949 = vst [vmem:[#allocation10 + $0x20] sm:$0xff] %v931_v57  ;;  %v934_v60 = vadd.f32 %v1037_v0, %v933_v59  ;;  %v935_v61 = vpop.f32.mrb[27].mxu0 }
 0x457   :  { %950 = vst [vmem:[#allocation10 + $0x28] sm:$0xff] %v934_v60 }
 0x45a   :  { %v938_v62 = vpop.f32.mrb[28].mxu0 }
 0x45b   :  { %v939_v63 = vadd.f32 %v1037_v0, %v938_v62  ;;  %v940_v1 = vpop.f32.mrb[29].mxu0 }
 0x45c   :  { %v941_v2 = vpop.f32.mrb[30].mxu0 }
 0x45d   :  { %951 = vst [vmem:[#allocation10 + $0x30] sm:$0xff] %v939_v63  ;;  %v942_v3 = vadd.f32 %v1037_v0, %v941_v2  ;;  %v943_v4 = vpop.f32.mrb[31].mxu0 }
 0x45f   :  { %952 = vst [vmem:[#allocation10 + $0x38] sm:$0xff] %v942_v3 }
 0x460   :  { %1305 = shalt.err (!%p1302_p8)
}
 0x461   :  { %s1306_s7 = scalar_lea.hbm %s1521_s6, 1024 }
 0x462   :  { %p1307_p9 = scmp.ne.s32.totalorder %s1521_s6, %s1306_s7  ;;  %p1310_p10 = scmp.lt.u32.totalorder %s1306_s7, %s1521_s6 }
 0x464   :  { %p1312_p11 = pnand %p1310_p10, %p1307_p9 }
 0x466   :  { %1315 = shalt.err (!%p1312_p11)
}
 0x467   :  { %964 = dma.vmem_to_hbm [thread:$0]  %s959_s27, 1024, %s1521_s6, [#allocation4], %s1328_s1, %s1328_s1, %s1329_s21  }
 0x468   :  { %1322 = dma.done.wait [#allocation4], 1024  }
 0x469   :  { %1323 = vsyncadd [#allocation4], 4294966272 }
 0x46a   :  { %968 = vsyncpa [#allocation3], 1 }
 0x46b   :  { %969 = vsyncpa [#allocation6], 1 }
 0x46c   :  { %970 = vsyncpa [#allocation9], 1 }
 0x46d   :  { %971 = vsyncpa [#allocation4], 1 }

</bundles_post_ra>
